<compile_context>
chip_gen: v7x
topology: tpu7x:2x2x1
jax: 0.10.0
libtpu: 0.0.40
codegen_flags: <defaults>
</compile_context>

<pallas_src>
import math
from functools import partial

import jax
import jax.numpy as jnp
from jax.experimental import pallas as pl
from jax.experimental.pallas import tpu as pltpu

_MAX_LANE = 1024                       # preferred lane-dense last dim
_DEF_BLOCK_BYTES = 4 * 1024 * 1024     # per streamed input per grid step


def _cfl_kernel(hs_ref, ht_ref, ftp_ref, ftt_ref, out_ref, acc_ref, *,
                beta, inv_nc, inv_m, blocks_per_split, full_blocks, tail_rows):
    c = pl.program_id(0)               # core-split axis  ("parallel")
    b = pl.program_id(1)               # row-block axis   ("arbitrary")

    # ---- init the lane-preserving accumulator once per split ---------------
    @pl.when(b == 0)
    def _init():
        acc_ref[...] = jnp.zeros_like(acc_ref)

    blk = c * blocks_per_split + b     # logical row-block index

    # ---- fully in-bounds block: plain streamed sum of squares --------------
    @pl.when(blk < full_blocks)
    def _full():
        d = ftp_ref[...].astype(jnp.float32) - ftt_ref[...].astype(jnp.float32)
        acc_ref[...] += jnp.sum(d * d, axis=0, keepdims=True)

    # ---- ragged tail block: static sub-slice, no mask needed ---------------
    if tail_rows:                      # static python condition
        @pl.when(blk == full_blocks)
        def _tail():
            d = (ftp_ref[:tail_rows, :].astype(jnp.float32)
                 - ftt_ref[:tail_rows, :].astype(jnp.float32))
            acc_ref[...] += jnp.sum(d * d, axis=0, keepdims=True)
    # logical blocks beyond the array (odd block count split two ways)
    # contribute nothing: no branch taken.

    # ---- finalize: per-split partial (+ the tiny KL term on split 0) -------
    @pl.when(b == pl.num_programs(1) - 1)
    def _fin():
        part = jnp.sum(acc_ref[...]) * jnp.float32(beta * inv_m)   # scalar

        @pl.when(c == 0)
        def _with_kl():
            hs = hs_ref[...].astype(jnp.float32)                   # (N, C)
            hs_sh = hs - jnp.max(hs, axis=-1, keepdims=True)
            log_q = hs_sh - jnp.log(
                jnp.sum(jnp.exp(hs_sh), axis=-1, keepdims=True))

            ht = ht_ref[...].astype(jnp.float32)                   # (T, N, C)
            sh = ht - jnp.max(ht, axis=-1, keepdims=True)
            e = jnp.exp(sh)
            z = jnp.sum(e, axis=-1, keepdims=True)
            p = e / z
            log_p = sh - jnp.log(z)
            # kl_div(log_q, p, reduction='mean') summed over teachers;
            # (N, C) log_q broadcasts against (T, N, C).
            kl_sum = jnp.sum(p * (log_p - log_q))
            val = part + kl_sum * jnp.float32(inv_nc)
            out_ref[...] = jnp.broadcast_to(val, out_ref.shape)

        @pl.when(c != 0)
        def _mse_only():
            out_ref[...] = jnp.broadcast_to(part, out_ref.shape)


def common_feature_learning_loss(hs, ht, ft_, ft, beta: float = 1.0,
                                 max_block_bytes: int = _DEF_BLOCK_BYTES):
    """hs: (N, C), ht: (T, N, C), ft_/ft: (T, *feat). Returns scalar f32."""
    assert ft_.shape == ft.shape
    T = ft_.shape[0]
    M = int(math.prod(ft_.shape[1:]))          # per-teacher element count
    total = T * M
    N, C = hs.shape
    itemsize = ft_.dtype.itemsize

    # ---- lane-dense 2-D view of the streamed feature maps (no pad) ---------
    lane = 0
    for cand in range(_MAX_LANE, 0, -128):
        if total % cand == 0:
            lane = cand
            break
    if lane:
        ftp = jnp.reshape(ft_, (total // lane, lane))
        ftt = jnp.reshape(ft, (total // lane, lane))
    else:
        # Fallback: element count not a multiple of 128 -> minimal tail pad
        # (one extra copy of the feature maps; zeros contribute 0 to the MSE).
        lane = 128
        pad = (-total) % lane
        ftp = jnp.reshape(jnp.pad(jnp.ravel(ft_), (0, pad)), (-1, lane))
        ftt = jnp.reshape(jnp.pad(jnp.ravel(ft), (0, pad)), (-1, lane))
    rows = ftp.shape[0]

    # ---- block geometry -----------------------------------------------------
    mult = max(8, 32 // itemsize)              # sublane packing (f32:8, bf16:16)
    target_rows = max(1, max_block_bytes // (lane * itemsize))
    block_rows = max(mult, (min(target_rows, rows) // mult) * mult)
    blocks_total = -(-rows // block_rows)
    rem = rows % block_rows
    full_blocks = blocks_total - (1 if rem else 0)
    tail_rows = rem                            # 0 -> no ragged tail block
    nsplit = 2 if blocks_total >= 2 else 1     # megacore split (v7x); cheap elsewhere
    bps = -(-blocks_total // nsplit)           # blocks per split

    def _feat_map(c, b):
        blk = c * bps + b
        # Clamp so the (rare) padding step of an odd split stays in bounds;
        # the kernel skips it, so re-reading the last block is harmless.
        return (jnp.minimum(blk, blocks_total - 1), 0)

    grid_spec = pltpu.PrefetchScalarGridSpec(
        num_scalar_prefetch=0,
        grid=(nsplit, bps),
        in_specs=[
            # TODO(synk): hs/ht are kept fully VMEM-resident (untiled KL); for
            # very large T*N*C the KL would need tiling over N.
            pl.BlockSpec(hs.shape, lambda c, b: (0, 0)),        # tiny, resident
            pl.BlockSpec(ht.shape, lambda c, b: (0, 0, 0)),     # tiny, resident
            pl.BlockSpec((block_rows, lane), _feat_map),
            pl.BlockSpec((block_rows, lane), _feat_map),
        ],
        # Lane-dense per-split partials: one (1, 128) block per split.
        out_specs=pl.BlockSpec((1, 128), lambda c, b: (0, c)),
        scratch_shapes=[pltpu.VMEM((1, lane), jnp.float32)],
    )

    feat_bytes = (ftp.size + ftt.size) * itemsize
    cost = pl.CostEstimate(
        flops=int(4 * ftp.size + 12 * ht.size),
        transcendentals=int(2 * ht.size + hs.size),
        bytes_accessed=int(feat_bytes + hs.size * hs.dtype.itemsize
                           + ht.size * ht.dtype.itemsize + nsplit * 128 * 4),
    )

    partials = pl.pallas_call(
        partial(_cfl_kernel, beta=float(beta),
                inv_nc=1.0 / float(N * C), inv_m=1.0 / float(M),
                blocks_per_split=bps, full_blocks=full_blocks,
                tail_rows=tail_rows),
        out_shape=jax.ShapeDtypeStruct((1, nsplit * 128), jnp.float32),
        grid_spec=grid_spec,
        compiler_params=pltpu.CompilerParams(
            dimension_semantics=("parallel", "arbitrary"),
            vmem_limit_bytes=48 * 1024 * 1024),
        cost_estimate=cost,
    )(hs, ht, ftp, ftt)

    # Every lane of a split's block holds the same partial; combine splits.
    return jnp.sum(partials[0, ::128])


def _reference(hs, ht, ft_, ft, beta=1.0):
    """Pure-JAX reference mirroring the PyTorch forward."""
    log_q = jax.nn.log_softmax(hs, axis=1)
    kl = 0.0
    for t in range(ht.shape[0]):
        p = jax.nn.softmax(ht[t], axis=1)
        kl = kl + jnp.mean(p * (jnp.log(p) - log_q))
    mse = 0.0
    for i in range(ft_.shape[0]):
        mse = mse + jnp.mean((ft_[i] - ft[i]) ** 2)
    return kl + beta * mse


if __name__ == "__main__":
    key = jax.random.PRNGKey(0)
    k1, k2, k3, k4 = jax.random.split(key, 4)

    # Small shapes consistent with the forward pass.
    N, C = 8, 32          # student/teacher logits
    T = 2                 # number of teachers
    Cf, H, W = 4, 16, 16  # feature maps (NCHW)

    hs  = jax.random.normal(k1, (N, C), jnp.float32)
    ht  = jax.random.normal(k2, (T, N, C), jnp.float32)
    ft_ = jax.random.normal(k3, (T, N, Cf, H, W), jnp.float32)
    ft  = jax.random.normal(k4, (T, N, Cf, H, W), jnp.float32)

    beta = 1.0  # deterministic "parameter" from __init__
    out = common_feature_learning_loss(hs, ht, ft_, ft, beta=beta)
    out = jax.block_until_ready(out)
    ref = _reference(hs, ht, ft_, ft, beta=beta)
    assert jnp.allclose(out, ref, rtol=1e-5, atol=1e-5), (out, ref)

    # Exercise the multi-block / two-way-split / ragged-tail paths with a
    # deliberately tiny block size (grid (2, 3), non-1024 lane width).
    k5, k6, k7, k8 = jax.random.split(jax.random.PRNGKey(1), 4)
    hs2  = jax.random.normal(k5, (N, C), jnp.float32)
    ht2  = jax.random.normal(k6, (3, N, C), jnp.float32)
    ft2_ = jax.random.normal(k7, (3, N, 4, 18, 18), jnp.float32)
    ft2  = jax.random.normal(k8, (3, N, 4, 18, 18), jnp.float32)
    out2 = common_feature_learning_loss(hs2, ht2, ft2_, ft2, beta=0.5,
                                        max_block_bytes=16 * 384 * 4)
    out2 = jax.block_until_ready(out2)
    ref2 = _reference(hs2, ht2, ft2_, ft2, beta=0.5)
    assert jnp.allclose(out2, ref2, rtol=1e-5, atol=1e-5), (out2, ref2)

    # Exercise the non-multiple-of-128 fallback path (minimal tail pad).
    k9, k10 = jax.random.split(jax.random.PRNGKey(2), 2)
    ft3_ = jax.random.normal(k9, (T, 3, 5, 7, 7), jnp.float32)
    ft3  = jax.random.normal(k10, (T, 3, 5, 7, 7), jnp.float32)
    out3 = common_feature_learning_loss(hs, ht, ft3_, ft3, beta=2.0)
    out3 = jax.block_until_ready(out3)
    ref3 = _reference(hs, ht, ft3_, ft3, beta=2.0)
    assert jnp.allclose(out3, ref3, rtol=1e-5, atol=1e-5), (out3, ref3)

    print("KERNEL_OK")
</pallas_src>

<mosaic_0001>
module attributes {stable_mosaic.version = 11 : i64} {
  func.func @_cfl_kernel(%arg0: i32, %arg1: i32, %arg2: memref<8x32xf32, #tpu.memory_space<vmem>>, %arg3: memref<2x8x32xf32, #tpu.memory_space<vmem>>, %arg4: memref<16x1024xf32, #tpu.memory_space<vmem>>, %arg5: memref<16x1024xf32, #tpu.memory_space<vmem>>, %arg6: memref<1x128xf32, #tpu.memory_space<vmem>>, %arg7: memref<1x1024xf32, #tpu.memory_space<vmem>>) attributes {dimension_semantics = [#tpu.dimension_semantics<parallel>, #tpu.dimension_semantics<arbitrary>], iteration_bounds = array<i64: 1, 1>, scalar_prefetch = 0 : i64, scratch_operands = 1 : i64, tpu.core_type = #tpu.core_type<tc>, window_params = [{pipeline_mode = #tpu.pipeline_mode<synchronous>, transform_indices = @transform_0, window_bounds = array<i64: 8, 32>}, {pipeline_mode = #tpu.pipeline_mode<synchronous>, transform_indices = @transform_1, window_bounds = array<i64: 2, 8, 32>}, {transform_indices = @transform_2, window_bounds = array<i64: 16, 1024>}, {transform_indices = @transform_3, window_bounds = array<i64: 16, 1024>}, {transform_indices = @transform_4, window_bounds = array<i64: 1, 128>}]} {
    %c0_i32 = arith.constant 0 : i32
    %0 = arith.cmpi eq, %arg1, %c0_i32 : i32
    %1 = arith.extui %0 : i1 to i32
    %c0_i32_0 = arith.constant 0 : i32
    %2 = arith.cmpi ne, %1, %c0_i32_0 : i32
    scf.if %2 {
      %cst = arith.constant 0.000000e+00 : f32
      %11 = vector.broadcast %cst : f32 to vector<1x1024xf32>
      %c0 = arith.constant 0 : index
      %c0_5 = arith.constant 0 : index
      %12 = vector.load %arg7[%c0, %c0_5] : memref<1x1024xf32, #tpu.memory_space<vmem>>, vector<1x1024xf32>
      tpu.vector_store %arg7[%c0, %c0_5], %11 {strides = array<i32>} : memref<1x1024xf32, #tpu.memory_space<vmem>>, vector<1x1024xf32>,
    } else {
    }
    %c1_i32 = arith.constant 1 : i32
    %3 = arith.muli %arg0, %c1_i32 : i32
    %4 = arith.addi %3, %arg1 : i32
    %c1_i32_1 = arith.constant 1 : i32
    %5 = arith.cmpi slt, %4, %c1_i32_1 : i32
    %6 = arith.extui %5 : i1 to i32
    %c0_i32_2 = arith.constant 0 : i32
    %7 = arith.cmpi ne, %6, %c0_i32_2 : i32
    scf.if %7 {
      %c0 = arith.constant 0 : index
      %c0_5 = arith.constant 0 : index
      %11 = vector.load %arg4[%c0, %c0_5] : memref<16x1024xf32, #tpu.memory_space<vmem>>, vector<16x1024xf32>
      %c0_6 = arith.constant 0 : index
      %c0_7 = arith.constant 0 : index
      %12 = vector.load %arg5[%c0_6, %c0_7] : memref<16x1024xf32, #tpu.memory_space<vmem>>, vector<16x1024xf32>
      %13 = arith.subf %11, %12 : vector<16x1024xf32>
      %c0_8 = arith.constant 0 : index
      %c0_9 = arith.constant 0 : index
      %14 = vector.load %arg7[%c0_8, %c0_9] : memref<1x1024xf32, #tpu.memory_space<vmem>>, vector<1x1024xf32>
      %15 = arith.mulf %13, %13 : vector<16x1024xf32>
      %cst = arith.constant dense<0.000000e+00> : vector<1024xf32>
      %16 = vector.multi_reduction <add>, %15, %cst [0] : vector<16x1024xf32> to vector<1024xf32>
      %17 = vector.shape_cast %16 : vector<1024xf32> to vector<1x1024xf32>
      %18 = arith.addf %14, %17 : vector<1x1024xf32>
      %c0_10 = arith.constant 0 : index
      %c0_11 = arith.constant 0 : index
      %19 = vector.load %arg7[%c0_10, %c0_11] : memref<1x1024xf32, #tpu.memory_space<vmem>>, vector<1x1024xf32>
      tpu.vector_store %arg7[%c0_10, %c0_11], %18 {strides = array<i32>} : memref<1x1024xf32, #tpu.memory_space<vmem>>, vector<1x1024xf32>,
    } else {
    }
    %c0_i32_3 = arith.constant 0 : i32
    %8 = arith.cmpi eq, %arg1, %c0_i32_3 : i32
    %9 = arith.extui %8 : i1 to i32
    %c0_i32_4 = arith.constant 0 : i32
    %10 = arith.cmpi ne, %9, %c0_i32_4 : i32
    scf.if %10 {
      %c0 = arith.constant 0 : index
      %c0_5 = arith.constant 0 : index
      %11 = vector.load %arg7[%c0, %c0_5] : memref<1x1024xf32, #tpu.memory_space<vmem>>, vector<1x1024xf32>
      %12 = vector.shape_cast %11 : vector<1x1024xf32> to vector<1x1x1024xf32>
      %cst = arith.constant dense<0.000000e+00> : vector<1xf32>
      %13 = vector.multi_reduction <add>, %12, %cst [1, 2] : vector<1x1x1024xf32> to vector<1xf32>
      %14 = vector.shape_cast %13 : vector<1xf32> to vector<1x1x1xf32>
      %15 = vector.extract %14[0, 0, 0] : f32 from vector<1x1x1xf32>
      %cst_6 = arith.constant 1.22070313E-4 : f32
      %16 = arith.mulf %15, %cst_6 : f32
      %c0_i32_7 = arith.constant 0 : i32
      %17 = arith.cmpi eq, %arg0, %c0_i32_7 : i32
      %18 = arith.extui %17 : i1 to i32
      %c0_i32_8 = arith.constant 0 : i32
      %19 = arith.cmpi ne, %18, %c0_i32_8 : i32
      scf.if %19 {
        %c0_11 = arith.constant 0 : index
        %c0_12 = arith.constant 0 : index
        %23 = vector.load %arg2[%c0_11, %c0_12] : memref<8x32xf32, #tpu.memory_space<vmem>>, vector<8x32xf32>
        %cst_13 = arith.constant dense<0xFF800000> : vector<8xf32>
        %24 = vector.multi_reduction <maximumf>, %23, %cst_13 [1] : vector<8x32xf32> to vector<8xf32>
        %25 = vector.shape_cast %24 : vector<8xf32> to vector<8x1xf32>
        %26 = vector.broadcast %25 : vector<8x1xf32> to vector<8x32xf32>
        %27 = arith.subf %23, %26 : vector<8x32xf32>
        %28 = math.exp %27 : vector<8x32xf32>
        %cst_14 = arith.constant dense<0.000000e+00> : vector<8xf32>
        %29 = vector.multi_reduction <add>, %28, %cst_14 [1] : vector<8x32xf32> to vector<8xf32>
        %30 = vector.shape_cast %29 : vector<8xf32> to vector<8x1xf32>
        %31 = math.log %30 : vector<8x1xf32>
        %32 = vector.broadcast %31 : vector<8x1xf32> to vector<8x32xf32>
        %33 = arith.subf %27, %32 : vector<8x32xf32>
        %c0_15 = arith.constant 0 : index
        %c0_16 = arith.constant 0 : index
        %c0_17 = arith.constant 0 : index
        %34 = vector.load %arg3[%c0_15, %c0_16, %c0_17] : memref<2x8x32xf32, #tpu.memory_space<vmem>>, vector<2x8x32xf32>
        %cst_18 = arith.constant dense<0xFF800000> : vector<2x8xf32>
        %35 = vector.multi_reduction <maximumf>, %34, %cst_18 [2] : vector<2x8x32xf32> to vector<2x8xf32>
        %36 = vector.shape_cast %35 : vector<2x8xf32> to vector<2x8x1xf32>
        %37 = vector.broadcast %36 : vector<2x8x1xf32> to vector<2x8x32xf32>
        %38 = arith.subf %34, %37 : vector<2x8x32xf32>
        %39 = math.exp %38 : vector<2x8x32xf32>
        %cst_19 = arith.constant dense<0.000000e+00> : vector<2x8xf32>
        %40 = vector.multi_reduction <add>, %39, %cst_19 [2] : vector<2x8x32xf32> to vector<2x8xf32>
        %41 = vector.shape_cast %40 : vector<2x8xf32> to vector<2x8x1xf32>
        %42 = vector.broadcast %41 : vector<2x8x1xf32> to vector<2x8x32xf32>
        %43 = arith.divf %39, %42 : vector<2x8x32xf32>
        %44 = math.log %41 : vector<2x8x1xf32>
        %45 = vector.broadcast %44 : vector<2x8x1xf32> to vector<2x8x32xf32>
        %46 = arith.subf %38, %45 : vector<2x8x32xf32>
        %47 = vector.shape_cast %33 : vector<8x32xf32> to vector<1x8x32xf32>
        %48 = vector.broadcast %47 : vector<1x8x32xf32> to vector<2x8x32xf32>
        %49 = arith.subf %46, %48 : vector<2x8x32xf32>
        %50 = arith.mulf %43, %49 : vector<2x8x32xf32>
        %51 = vector.shape_cast %50 : vector<2x8x32xf32> to vector<1x2x8x32xf32>
        %cst_20 = arith.constant dense<0.000000e+00> : vector<1xf32>
        %52 = vector.multi_reduction <add>, %51, %cst_20 [1, 2, 3] : vector<1x2x8x32xf32> to vector<1xf32>
        %53 = vector.shape_cast %52 : vector<1xf32> to vector<1x1x1x1xf32>
        %54 = vector.extract %53[0, 0, 0, 0] : f32 from vector<1x1x1x1xf32>
        %cst_21 = arith.constant 3.906250e-03 : f32
        %55 = arith.mulf %54, %cst_21 : f32
        %56 = arith.addf %16, %55 : f32
        %57 = vector.broadcast %56 : f32 to vector<1x128xf32>
        %c0_22 = arith.constant 0 : index
        %c0_23 = arith.constant 0 : index
        %58 = vector.load %arg6[%c0_22, %c0_23] : memref<1x128xf32, #tpu.memory_space<vmem>>, vector<1x128xf32>
        tpu.vector_store %arg6[%c0_22, %c0_23], %57 {strides = array<i32>} : memref<1x128xf32, #tpu.memory_space<vmem>>, vector<1x128xf32>,
      } else {
      }
      %c0_i32_9 = arith.constant 0 : i32
      %20 = arith.cmpi ne, %arg0, %c0_i32_9 : i32
      %21 = arith.extui %20 : i1 to i32
      %c0_i32_10 = arith.constant 0 : i32
      %22 = arith.cmpi ne, %21, %c0_i32_10 : i32
      scf.if %22 {
        %23 = vector.broadcast %16 : f32 to vector<1x128xf32>
        %c0_11 = arith.constant 0 : index
        %c0_12 = arith.constant 0 : index
        %24 = vector.load %arg6[%c0_11, %c0_12] : memref<1x128xf32, #tpu.memory_space<vmem>>, vector<1x128xf32>
        tpu.vector_store %arg6[%c0_11, %c0_12], %23 {strides = array<i32>} : memref<1x128xf32, #tpu.memory_space<vmem>>, vector<1x128xf32>,
      } else {
      }
    } else {
    }
    return
  }
  func.func @transform_0(%arg0: i32, %arg1: i32) -> (i32, i32) {
    %c0_i32 = arith.constant 0 : i32
    %c0_i32_0 = arith.constant 0 : i32
    %c0_i32_1 = arith.constant 0 : i32
    return %c0_i32, %c0_i32_0 : i32, i32
  }
  func.func @transform_1(%arg0: i32, %arg1: i32) -> (i32, i32, i32) {
    %c0_i32 = arith.constant 0 : i32
    %c0_i32_0 = arith.constant 0 : i32
    %c0_i32_1 = arith.constant 0 : i32
    %c0_i32_2 = arith.constant 0 : i32
    return %c0_i32, %c0_i32_0, %c0_i32_1 : i32, i32, i32
  }
  func.func @transform_2(%arg0: i32, %arg1: i32) -> (i32, i32) {
    %c1_i32 = arith.constant 1 : i32
    %0 = arith.muli %arg0, %c1_i32 : i32
    %1 = arith.addi %0, %arg1 : i32
    %c0_i32 = arith.constant 0 : i32
    %2 = arith.minsi %1, %c0_i32 : i32
    %c0_i32_0 = arith.constant 0 : i32
    %c0_i32_1 = arith.constant 0 : i32
    return %2, %c0_i32_0 : i32, i32
  }
  func.func @transform_3(%arg0: i32, %arg1: i32) -> (i32, i32) {
    %c1_i32 = arith.constant 1 : i32
    %0 = arith.muli %arg0, %c1_i32 : i32
    %1 = arith.addi %0, %arg1 : i32
    %c0_i32 = arith.constant 0 : i32
    %2 = arith.minsi %1, %c0_i32 : i32
    %c0_i32_0 = arith.constant 0 : i32
    %c0_i32_1 = arith.constant 0 : i32
    return %2, %c0_i32_0 : i32, i32
  }
  func.func @transform_4(%arg0: i32, %arg1: i32) -> (i32, i32) {
    %c0_i32 = arith.constant 0 : i32
    %c0_i32_0 = arith.constant 0 : i32
    return %c0_i32, %arg0 : i32, i32
  }
}

</mosaic_0001>

<bundles_post_ra>
// kernel: tpu_custom_call.1
= control target key start
LH: loop header
LB: loop body
LE: loop exit
PB: predicated region body
PF: predicated region fallthrough
CT: control target
= control target key end

     0   :  { %9 = vsyncpa [#allocation4], 0  ;;  %s729_s0 = inlined_call_operand.hbm [shape: f32[8,32], index: 0, kind: input, shape index: {}]   ;;  %s730_s1 = inlined_call_operand.hbm [shape: f32[2,8,32], index: 1, kind: input, shape index: {}]   ;;  %s731_s2 = inlined_call_operand.hbm [shape: f32[16,1024], index: 2, kind: input, shape index: {}]   ;;  %s732_s3 = inlined_call_operand.hbm [shape: f32[16,1024], index: 3, kind: input, shape index: {}]   ;;  %s733_s4 = inlined_call_operand.hbm [shape: f32[1,128], index: 4, kind: output, shape index: {}]  }
   0x1   :  { %10 = vsyncpa [#allocation7], 0 }
   0x2   :  { %11 = vsyncpa [#allocation10], 0 }
   0x3   :  { %12 = vsyncpa [#allocation5], 0  ;;  %s598_s15 = smov [#allocation6]   ;;  %s480_s19 = scalar_lea.hbm %s730_s1, 256 }
   0x4   :  { %s28_s16 = sshll.u32 %s598_s15, 4  ;;  %p481_p0 = scmp.ne.s32.totalorder %s730_s1, %s480_s19  ;;  %s29_s16 = int_to_ptr.vmem [resolvable:$true] %s28_s16 }
   0x5   :  { %p484_p1 = scmp.lt.u32.totalorder %s480_s19, %s730_s1 }
   0x7   :  { %p486_p2 = pnand %p484_p1, %p481_p0 }
   0x9   :  { %489 = shalt.err (!%p486_p2)
}
   0xa   :  { %s490_s24 = scalar_lea.vmem %s29_s16, 256  ;;  %p495_p4 = scmp.lt.s32.totalorder %s29_s16, %s29_s16 }
   0xb   :  { %p491_p3 = scmp.ne.s32.totalorder %s29_s16, %s490_s24  ;;  %p496_p5 = scmp.lt.s32.totalorder %s490_s24, %s490_s24 }
   0xd   :  { %p497_p6 = por %p496_p5, %p495_p4 }
   0xf   :  { %p498_p7 = pnand %p497_p6, %p491_p3 }
  0x11   :  { %501 = shalt.err (!%p498_p7)
}
  0x12   :  { %s599_s25 = smov 128   ;;  %s600_s26 = smov 8  }
  0x13   :  { %34 = dma.hbm_to_vmem [thread:$0]  %s730_s1, 256, %s29_s16, [#allocation7], %s599_s25, %s599_s25, %s600_s26  }
  0x14   :  { %s601_s29 = smov [#allocation3]   ;;  %s602_s5 = smov [#allocation8]  }
  0x15   :  { %s19_s30 = sshll.u32 %s601_s29, 4  ;;  %s47_s6 = sshll.u32 %s602_s5, 4  ;;  %s20_s30 = int_to_ptr.vmem [resolvable:$true] %s19_s30  ;;  %s48_s6 = int_to_ptr.vmem [resolvable:$true] %s47_s6 }
  0x16   :  { %s502_s9 = scalar_lea.hbm %s729_s0, 128 }
  0x17   :  { %p503_p8 = scmp.ne.s32.totalorder %s729_s0, %s502_s9  ;;  %p506_p9 = scmp.lt.u32.totalorder %s502_s9, %s729_s0 }
  0x19   :  { %p508_p10 = pnand %p506_p9, %p503_p8 }
  0x1b   :  { %511 = shalt.err (!%p508_p10)
}
  0x1c   :  { %s512_s1 = scalar_lea.vmem %s20_s30, 128  ;;  %p517_p12 = scmp.lt.s32.totalorder %s20_s30, %s20_s30 }
  0x1d   :  { %p513_p11 = scmp.ne.s32.totalorder %s20_s30, %s512_s1  ;;  %p518_p13 = scmp.lt.s32.totalorder %s512_s1, %s512_s1 }
  0x1f   :  { %p519_p0 = por %p518_p13, %p517_p12 }
  0x21   :  { %p520_p1 = pnand %p519_p0, %p513_p11 }
  0x23   :  { %523 = shalt.err (!%p520_p1)
}
  0x24   :  { %22 = dma.hbm_to_vmem [thread:$0]  %s729_s0, 128, %s20_s30, [#allocation4]  }
  0x25   :  { %s524_s18 = scalar_lea.hbm %s731_s2, 2048 }
  0x26   :  { %p525_p2 = scmp.ne.s32.totalorder %s731_s2, %s524_s18  ;;  %p528_p3 = scmp.lt.u32.totalorder %s524_s18, %s731_s2 }
  0x28   :  { %p530_p4 = pnand %p528_p3, %p525_p2 }
  0x2a   :  { %533 = shalt.err (!%p530_p4)
}
  0x2b   :  { %s534_s23 = scalar_lea.vmem %s48_s6, 2048  ;;  %p539_p6 = scmp.lt.s32.totalorder %s48_s6, %s48_s6 }
  0x2c   :  { %p535_p5 = scmp.ne.s32.totalorder %s48_s6, %s534_s23  ;;  %p540_p7 = scmp.lt.s32.totalorder %s534_s23, %s534_s23 }
  0x2e   :  { %p541_p8 = por %p540_p7, %p539_p6 }
  0x30   :  { %p542_p9 = pnand %p541_p8, %p535_p5 }
  0x32   :  { %545 = shalt.err (!%p542_p9)
}
  0x33   :  { %s603_s0 = smov 1024   ;;  %s604_s24 = smov 64  }
  0x34   :  { %53 = dma.hbm_to_vmem [thread:$0]  %s731_s2, 2048, %s48_s6, [#allocation7], %s603_s0, %s603_s0, %s604_s24  }
  0x35   :  { %s605_s27 = smov [#allocation9]   ;;  %s546_s5 = scalar_lea.hbm %s732_s3, 2048 }
  0x36   :  { %s66_s28 = sshll.u32 %s605_s27, 4  ;;  %p547_p10 = scmp.ne.s32.totalorder %s732_s3, %s546_s5  ;;  %s67_s28 = int_to_ptr.vmem [resolvable:$true] %s66_s28 }
  0x37   :  { %p550_p11 = scmp.lt.u32.totalorder %s546_s5, %s732_s3 }
  0x39   :  { %p552_p12 = pnand %p550_p11, %p547_p10 }
  0x3b   :  { %555 = shalt.err (!%p552_p12)
}
  0x3c   :  { %s556_s11 = scalar_lea.vmem %s67_s28, 2048  ;;  %p561_p0 = scmp.lt.s32.totalorder %s67_s28, %s67_s28 }
  0x3d   :  { %p557_p13 = scmp.ne.s32.totalorder %s67_s28, %s556_s11  ;;  %p562_p1 = scmp.lt.s32.totalorder %s556_s11, %s556_s11 }
  0x3f   :  { %p563_p2 = por %p562_p1, %p561_p0 }
  0x41   :  { %p564_p3 = pnand %p563_p2, %p557_p13 }
  0x43   :  { %567 = shalt.err (!%p564_p3)
}
  0x44   :  { %72 = dma.hbm_to_vmem [thread:$0]  %s732_s3, 2048, %s67_s28, [#allocation10], %s603_s0, %s603_s0, %s604_s24  }
  0x45   :  { %590 = dma.done.wait [#allocation4], 128  }
  0x46   :  { %591 = vsyncadd [#allocation4], 4294967168 }
  0x47   :  { %592 = dma.done.wait [#allocation7], 2304  }
  0x48   :  { %593 = vsyncadd [#allocation7], 4294964992 }
  0x49   :  { %594 = dma.done.wait [#allocation10], 2048  }
  0x4a   :  { %595 = vsyncadd [#allocation10], 4294965248  ;;  %vm360_vm0 = vcmask 261120   ;;  %v359_v0 = vld [vmem:[#allocation3] sm:$0xff]  ;;  %v374_v1 = vld [vmem:[#allocation6 + $0x8] sm:$0xff]  ;;  %vm329_vm1 = vcmask 1040384  }
  0x4b   :  { %v373_v2 = vld [vmem:[#allocation6] sm:$0xff]  ;;  %v361_v3 = vsel %vm360_vm0, %v359_v0, -inf  ;;  %v378_v4 = vsel %vm360_vm0, %v374_v1, -inf  ;;  %v103_v15 = vld [vmem:[#allocation8] sm:$0xff]  ;;  %v104_v16 = vld [vmem:[#allocation8 + $0x8] sm:$0xff]  ;;  %s607_s14 = smov [#allocation11]  }
  0x4c   :  { %362 = vmax.xlane.f32.xlu0 %v361_v3  ;;  %379 = vmax.xlane.f32.xlu1 %v378_v4  ;;  %v375_v5 = vsel %vm360_vm0, %v373_v2, -inf  ;;  %v105_v17 = vld [vmem:[#allocation8 + $0x10] sm:$0xff]  ;;  %v106_v18 = vld [vmem:[#allocation8 + $0x18] sm:$0xff]  ;;  %v107_v19 = vld [vmem:[#allocation8 + $0x20] sm:$0xff]  ;;  %s435_s15 = sshll.u32 %s607_s14, 4  ;;  %s436_s15 = int_to_ptr.vmem [resolvable:$true] %s435_s15 }
  0x4d   :  { %v108_v20 = vld [vmem:[#allocation8 + $0x28] sm:$0xff]  ;;  %v109_v21 = vld [vmem:[#allocation8 + $0x30] sm:$0xff]  ;;  %v110_v22 = vld [vmem:[#allocation8 + $0x38] sm:$0xff]  ;;  %s568_s17 = scalar_lea.vmem %s436_s15, 16  ;;  %s572_s18 = scalar_lea.vmem %s436_s15, 32 }
  0x4e   :  { %v111_v23 = vld [vmem:[#allocation8 + $0x40] sm:$0xff]  ;;  %v112_v24 = vld [vmem:[#allocation8 + $0x48] sm:$0xff]  ;;  %v113_v25 = vld [vmem:[#allocation8 + $0x50] sm:$0xff]  ;;  %p569_p4 = scmp.ne.s32.totalorder %s436_s15, %s568_s17  ;;  %p573_p5 = scmp.lt.s32.totalorder %s436_s15, %s436_s15 }
  0x4f   :  { %v114_v26 = vld [vmem:[#allocation8 + $0x58] sm:$0xff]  ;;  %v115_v27 = vld [vmem:[#allocation8 + $0x60] sm:$0xff]  ;;  %v116_v28 = vld [vmem:[#allocation8 + $0x68] sm:$0xff]  ;;  %p574_p6 = scmp.lt.s32.totalorder %s572_s18, %s568_s17 }
  0x50   :  { %376 = vmax.xlane.f32.xlu0 %v375_v5  ;;  %v119_v29 = vld [vmem:[#allocation9] sm:$0xff]  ;;  %v120_v30 = vld [vmem:[#allocation9 + $0x8] sm:$0xff]  ;;  %v117_v31 = vld [vmem:[#allocation8 + $0x70] sm:$0xff] }
  0x51   :  { %v118_v32 = vld [vmem:[#allocation8 + $0x78] sm:$0xff]  ;;  %v121_v33 = vld [vmem:[#allocation9 + $0x10] sm:$0xff]  ;;  %v123_v35 = vld [vmem:[#allocation9 + $0x20] sm:$0xff]  ;;  %v135_v36 = vsub.f32 %v103_v15, %v119_v29  ;;  %v136_v41 = vsub.f32 %v104_v16, %v120_v30  ;;  %p575_p7 = por %p574_p6, %p573_p5 }
  0x52   :  { %v122_v34 = vld [vmem:[#allocation9 + $0x18] sm:$0xff]  ;;  %v124_v38 = vld [vmem:[#allocation9 + $0x28] sm:$0xff]  ;;  %v125_v39 = vld [vmem:[#allocation9 + $0x30] sm:$0xff]  ;;  %v137_v42 = vsub.f32 %v105_v17, %v121_v33  ;;  %v139_v44 = vsub.f32 %v107_v19, %v123_v35 }
  0x53   :  { %v126_v40 = vld [vmem:[#allocation9 + $0x38] sm:$0xff]  ;;  %v138_v43 = vsub.f32 %v106_v18, %v122_v34  ;;  %v127_v47 = vld [vmem:[#allocation9 + $0x40] sm:$0xff]  ;;  %v128_v48 = vld [vmem:[#allocation9 + $0x48] sm:$0xff]  ;;  %v140_v50 = vsub.f32 %v108_v20, %v124_v38  ;;  %v141_v51 = vsub.f32 %v109_v21, %v125_v39  ;;  %v153_v5 = vmul.f32 %v136_v41, %v136_v41  ;;  %p576_p8 = pnand %p575_p7, %p569_p4 }
  0x54   :  { %v129_v49 = vld [vmem:[#allocation9 + $0x50] sm:$0xff]  ;;  %v142_v52 = vsub.f32 %v110_v22, %v126_v40  ;;  %v130_v54 = vld [vmem:[#allocation9 + $0x58] sm:$0xff]  ;;  %v131_v55 = vld [vmem:[#allocation9 + $0x60] sm:$0xff]  ;;  %v143_v57 = vsub.f32 %v111_v23, %v127_v47  ;;  %v144_v58 = vsub.f32 %v112_v24, %v128_v48 }
  0x55   :  { %v132_v56 = vld [vmem:[#allocation9 + $0x68] sm:$0xff]  ;;  %v145_v59 = vsub.f32 %v113_v25, %v129_v49  ;;  %v133_v60 = vld [vmem:[#allocation9 + $0x70] sm:$0xff]  ;;  %v134_v61 = vld [vmem:[#allocation9 + $0x78] sm:$0xff]  ;;  %v146_v62 = vsub.f32 %v114_v26, %v130_v54  ;;  %v147_v63 = vsub.f32 %v115_v27, %v131_v55 }
  0x56   :  { %v149_v3 = vsub.f32 %v117_v31, %v133_v60  ;;  %v150_v4 = vsub.f32 %v118_v32, %v134_v61  ;;  %v159_v15 = vmul.f32 %v142_v52, %v142_v52  ;;  %v160_v16 = vmul.f32 %v143_v57, %v143_v57 }
  0x57   :  { %v161_v17 = vmul.f32 %v144_v58, %v144_v58  ;;  %v162_v18 = vmul.f32 %v145_v59, %v145_v59  ;;  %v163_v19 = vmul.f32 %v146_v62, %v146_v62  ;;  %v164_v20 = vmul.f32 %v147_v63, %v147_v63 }
  0x58   :  { %v166_v22 = vmul.f32 %v149_v3, %v149_v3  ;;  %v167_v23 = vmul.f32 %v150_v4, %v150_v4 }
  0x59   :  { %v175_v25 = vadd.f32 %v161_v17, %v153_v5 }
  0x5a   :  { %v217_v32 = vadd.f32 %v167_v23, %v159_v15  ;;  %v239_v23 = vlaneseq }
  0x5b   :  { %v176_v33 = vrot.slane %v175_v25, 4 }
  0x5c   :  { %v218_v40 = vrot.slane %v217_v32, 4 }
  0x5d   :  { %v177_v41 = vadd.f32 %v176_v33, %v175_v25 }
  0x5e   :  { %v219_v49 = vadd.f32 %v218_v40, %v217_v32 }
  0x60   :  { %v220_v57 = vrot.slane %v219_v49, 2 }
  0xd9   :  { %v363_v6 = vpop.xlane.xlu0 %362  ;;  %v380_v7 = vpop.xlane.xlu1 %379 }
  0xda   :  { %v684_v8 = vsub.f32 %v359_v0, %v363_v6  ;;  %v686_v9 = vsub.f32 %v374_v1, %v380_v7  ;;  %v148_v0 = vsub.f32 %v116_v28, %v132_v56  ;;  %v152_v1 = vmul.f32 %v135_v36, %v135_v36 }
  0xdb   :  { %v154_v6 = vmul.f32 %v137_v42, %v137_v42 }
  0xdc   :  { %v365_v10 = vmul.f32 1.442695, %v684_v8  ;;  %v385_v11 = vmul.f32 1.442695, %v686_v9  ;;  %v165_v21 = vmul.f32 %v148_v0, %v148_v0  ;;  %v168_v24 = vadd.f32 %v160_v16, %v152_v1 }
  0xdd   :  { %v377_v12 = vpop.xlane.xlu0 %376  ;;  %v182_v26 = vadd.f32 %v162_v18, %v154_v6  ;;  %v221_v1 = vadd.f32 %v220_v57, %v219_v49 }
  0xde   :  { %464 = vpow2.f32 %v365_v10  ;;  %v690_v13 = vsub.f32 %v373_v2, %v377_v12  ;;  %v155_v10 = vmul.f32 %v138_v43, %v138_v43  ;;  %v157_v12 = vmul.f32 %v140_v50, %v140_v50 }
  0xdf   :  { %466 = vpow2.f32 %v385_v11  ;;  %v156_v11 = vmul.f32 %v139_v44, %v139_v44  ;;  %v169_v29 = vrot.slane %v168_v24, 4  ;;  %v183_v34 = vrot.slane %v182_v26, 4 }
  0xe0   :  { %v383_v14 = vmul.f32 1.442695, %v690_v13  ;;  %v189_v27 = vadd.f32 %v163_v19, %v155_v10  ;;  %v203_v30 = vadd.f32 %v165_v21, %v157_v12  ;;  %v178_v50 = vrot.slane %v177_v41, 2 }
  0xe1   :  { %v196_v28 = vadd.f32 %v164_v20, %v156_v11  ;;  %v184_v42 = vadd.f32 %v183_v34, %v182_v26  ;;  %v222_v12 = vrot.slane %v221_v1, 1  ;;  %v606_v21 = vmov 1966171168  }
  0xe2   :  { %468 = vpow2.f32 %v383_v14  ;;  %v158_v14 = vmul.f32 %v141_v51, %v141_v51  ;;  %v190_v35 = vrot.slane %v189_v27, 4  ;;  %v204_v38 = vrot.slane %v203_v30, 4 }
  0xe3   :  { %v197_v36 = vrot.slane %v196_v28, 4  ;;  %v185_v51 = vrot.slane %v184_v42, 2  ;;  %v179_v58 = vadd.f32 %v178_v50, %v177_v41  ;;  %v223_v20 = vadd.f32 %v222_v12, %v221_v1 }
  0xe4   :  { %v210_v31 = vadd.f32 %v166_v22, %v158_v14  ;;  %v191_v43 = vadd.f32 %v190_v35, %v189_v27  ;;  %v205_v47 = vadd.f32 %v204_v38, %v203_v30  ;;  %v237_v22 = vunpack.c.l.s4 %v606_v21 }
  0xe5   :  { %v198_v44 = vadd.f32 %v197_v36, %v196_v28  ;;  %v186_v59 = vadd.f32 %v185_v51, %v184_v42  ;;  %v180_v3 = vrot.slane %v179_v58, 1 }
  0xe6   :  { %v211_v39 = vrot.slane %v210_v31, 4  ;;  %v192_v52 = vrot.slane %v191_v43, 2  ;;  %v206_v55 = vrot.slane %v205_v47, 2  ;;  %v238_v28 = vunpack.c.0.s8 %v237_v22 }
  0xe7   :  { %v187_v4 = vrot.slane %v186_v59, 1  ;;  %v181_v14 = vadd.f32 %v180_v3, %v179_v58 }
  0xe8   :  { %v465_v37 = vpop.eup %464  ;;  %v212_v48 = vadd.f32 %v211_v39, %v210_v31  ;;  %v193_v60 = vadd.f32 %v192_v52, %v191_v43  ;;  %v207_v63 = vadd.f32 %v206_v55, %v205_v47 }
  0xe9   :  { %v693_v45 = vpop.eup %466  ;;  %v367_v46 = vsel %vm360_vm0, %v465_v37, 0.0  ;;  %v170_v37 = vadd.f32 %v169_v29, %v168_v24  ;;  %v188_v15 = vadd.f32 %v187_v4, %v186_v59  ;;  %v240_v29 = vshrl.u32 %v239_v23, 7 }
  0xea   :  { %368 = vadd.xlane.f32.xlu1 %v367_v46  ;;  %v390_v53 = vsel %vm360_vm0, %v693_v45, 0.0  ;;  %v213_v56 = vrot.slane %v212_v48, 2  ;;  %v194_v5 = vrot.slane %v193_v60, 1  ;;  %v208_v10 = vrot.slane %v207_v63, 1 }
  0xeb   :  { %v171_v46 = vrot.slane %v170_v37, 2  ;;  %v241_v30 = vsub.s32 %v238_v28, %v240_v29  ;;  %v295_v38 = vsub.s32 1, %v240_v29  ;;  %v299_v41 = vsub.s32 2, %v240_v29 }
  0xec   :  { %v698_v2 = vpop.eup %468  ;;  %v214_v0 = vadd.f32 %v213_v56, %v212_v48  ;;  %v195_v16 = vadd.f32 %v194_v5, %v193_v60  ;;  %v209_v18 = vadd.f32 %v208_v10, %v207_v63  ;;  %v303_v42 = vsub.s32 3, %v240_v29 }
  0xed   :  { %v387_v7 = vsel %vm360_vm0, %v698_v2, 0.0  ;;  %v172_v54 = vadd.f32 %v171_v46, %v170_v37  ;;  %v291_v37 = vsub.s32 0, %v240_v29  ;;  %v311_v46 = vsub.s32 5, %v240_v29 }
  0xee   :  { %391 = vadd.xlane.f32.xlu1 %v390_v53  ;;  %388 = vadd.xlane.f32.xlu0 %v387_v7  ;;  %v199_v53 = vrot.slane %v198_v44, 2  ;;  %v215_v11 = vrot.slane %v214_v0, 1  ;;  %v233_v25 = vcombine.low %v188_v15, %v195_v16  ;;  %v315_v51 = vsub.s32 6, %v240_v29 }
  0xef   :  { %v173_v62 = vrot.slane %v172_v54, 1  ;;  %v319_v58 = vsub.s32 7, %v240_v29 }
  0xf0   :  { %v200_v61 = vadd.f32 %v199_v53, %v198_v44  ;;  %v216_v19 = vadd.f32 %v215_v11, %v214_v0  ;;  %v249_v32 = vrot.slane %v233_v25, %v241_v30  ;;  %v307_v44 = vsub.s32 4, %v240_v29 }
  0xf1   :  { %v174_v7 = vadd.f32 %v173_v62, %v172_v54 }
  0xf2   :  { %v201_v6 = vrot.slane %v200_v61, 1  ;;  %v235_v27 = vcombine.low %v216_v19, %v223_v20 }
  0xf3   :  { %v232_v24 = vcombine.low %v174_v7, %v181_v14 }
  0xf4   :  { %v202_v17 = vadd.f32 %v201_v6, %v200_v61  ;;  %v263_v34 = vrot.slane %v235_v27, %v241_v30 }
  0xf5   :  { %v242_v31 = vrot.slane %v232_v24, %v241_v30 }
  0xf6   :  { %v234_v26 = vcombine.low %v202_v17, %v209_v18 }
  0xf7   :  { %v264_v35 = vcombine.low %v242_v31, %v249_v32 }
  0xf8   :  { %v256_v33 = vrot.slane %v234_v26, %v241_v30 }
  0xf9   :  { %v272_v39 = vrot.slane %v264_v35, %v241_v30 }
  0xfa   :  { %v265_v36 = vcombine.low %v256_v33, %v263_v34 }
  0xfc   :  { %v279_v40 = vrot.slane %v265_v36, %v241_v30 }
  0xfe   :  { %v280_v43 = vcombine.low %v272_v39, %v279_v40 }
 0x100   :  { %v292_v47 = vrot.slane %v280_v43, %v291_v37  ;;  %v296_v48 = vrot.slane %v280_v43, %v295_v38  ;;  %v300_v49 = vrot.slane %v280_v43, %v299_v41  ;;  %v304_v50 = vrot.slane %v280_v43, %v303_v42 }
 0x101   :  { %v308_v52 = vrot.slane %v280_v43, %v307_v44  ;;  %v312_v57 = vrot.slane %v280_v43, %v311_v46  ;;  %v316_v61 = vrot.slane %v280_v43, %v315_v51  ;;  %v320_v0 = vrot.slane %v280_v43, %v319_v58 }
 0x102   :  { %v330_v53 = vsel %vm329_vm1, %v292_v47, 0.0  ;;  %v331_v54 = vsel %vm329_vm1, %v296_v48, 0.0  ;;  %v333_v55 = vsel %vm329_vm1, %v300_v49, 0.0  ;;  %v335_v59 = vsel %vm329_vm1, %v304_v50, 0.0 }
 0x103   :  { %v332_v56 = vadd.f32 %v331_v54, %v330_v53  ;;  %v337_v62 = vsel %vm329_vm1, %v308_v52, 0.0  ;;  %v339_v1 = vsel %vm329_vm1, %v312_v57, 0.0  ;;  %v341_v4 = vsel %vm329_vm1, %v316_v61, 0.0 }
 0x104   :  { %v343_v6 = vsel %vm329_vm1, %v320_v0, 0.0 }
 0x105   :  { %v334_v60 = vadd.f32 %v333_v55, %v332_v56 }
 0x107   :  { %v336_v63 = vadd.f32 %v335_v59, %v334_v60 }
 0x109   :  { %v338_v3 = vadd.f32 %v337_v62, %v336_v63 }
 0x10b   :  { %v340_v5 = vadd.f32 %v339_v1, %v338_v3 }
 0x10d   :  { %v342_v7 = vadd.f32 %v341_v4, %v340_v5 }
 0x10f   :  { %v344_v10 = vadd.f32 %v343_v6, %v342_v7 }
 0x111   :  { %345 = vadd.xlane.f32.xlu0 %v344_v10 }
 0x177   :  { %v369_v11 = vpop.xlane.xlu1 %368 }
 0x178   :  { %470 = vlog2.f32 %v369_v11 }
 0x17b   :  { %v392_v12 = vpop.xlane.xlu1 %391  ;;  %v389_v14 = vpop.xlane.xlu0 %388 }
 0x17c   :  { %472 = vlog2.f32 %v392_v12 }
 0x17d   :  { %474 = vrcp.f32 %v392_v12 }
 0x17e   :  { %476 = vlog2.f32 %v389_v14 }
 0x17f   :  { %478 = vrcp.f32 %v389_v14 }
 0x182   :  { %v471_v15 = vpop.eup %470 }
 0x183   :  { %v371_v16 = vmul.f32 0.6931472, %v471_v15 }
 0x185   :  { %v372_v21 = vsub.f32 %v684_v8, %v371_v16 }
 0x186   :  { %v473_v17 = vpop.eup %472 }
 0x187   :  { %v475_v18 = vpop.eup %474  ;;  %v400_v19 = vmul.f32 0.6931472, %v473_v17 }
 0x188   :  { %v477_v20 = vpop.eup %476  ;;  %v396_v26 = vmul.f32 %v475_v18, %v693_v45 }
 0x189   :  { %v402_v22 = vsub.f32 %v686_v9, %v400_v19  ;;  %v398_v23 = vmul.f32 0.6931472, %v477_v20  ;;  %v479_v24 = vpop.eup %478 }
 0x18a   :  { %v394_v28 = vmul.f32 %v479_v24, %v698_v2 }
 0x18b   :  { %v401_v25 = vsub.f32 %v690_v13, %v398_v23  ;;  %v404_v27 = vsub.f32 %v402_v22, %v372_v21 }
 0x18d   :  { %v403_v29 = vsub.f32 %v401_v25, %v372_v21  ;;  %v406_v30 = vmul.f32 %v404_v27, %v396_v26 }
 0x18f   :  { %v405_v31 = vmul.f32 %v403_v29, %v394_v28  ;;  %v408_v32 = vsel %vm360_vm0, %v406_v30, 0.0 }
 0x191   :  { %v407_v33 = vsel %vm360_vm0, %v405_v31, 0.0 }
 0x192   :  { %v409_v34 = vadd.f32 %v408_v32, %v407_v33 }
 0x194   :  { %410 = vadd.xlane.f32.xlu1 %v409_v34 }
 0x19e   :  { %v346_v8 = vpop.xlane.xlu0 %345 }
 0x19f   :  { %v347_v9 = vrot.slane %v346_v8, 4 }
 0x1a1   :  { %v348_v35 = vadd.f32 %v347_v9, %v346_v8 }
 0x1a3   :  { %v349_v36 = vrot.slane %v348_v35, 2 }
 0x1a5   :  { %v350_v37 = vadd.f32 %v349_v36, %v348_v35 }
 0x1a7   :  { %v351_v13 = vrot.slane %v350_v37, 1 }
 0x1a9   :  { %v352_v38 = vadd.f32 %v351_v13, %v350_v37 }
 0x1ab   :  { %450 = vpush %v352_v38 }
 0x1dc   :  { %s451_s3 = spop %450 }
 0x1dd   :  { %s354_s12 = smul.f32 0.00012207031, %s451_s3 }
 0x221   :  { %v411_v45 = vpop.xlane.xlu1 %410 }
 0x222   :  { %v412_v39 = vrot.slane %v411_v45, 4 }
 0x224   :  { %v413_v2 = vadd.f32 %v412_v39, %v411_v45 }
 0x226   :  { %v414_v40 = vrot.slane %v413_v2, 2 }
 0x228   :  { %v415_v41 = vadd.f32 %v414_v40, %v413_v2 }
 0x22a   :  { %v416_v42 = vrot.slane %v415_v41, 1 }
 0x22c   :  { %v417_v43 = vadd.f32 %v416_v42, %v415_v41 }
 0x22e   :  { %452 = vpush %v417_v43 }
 0x25f   :  { %s453_s13 = spop %452 }
 0x260   :  { %s419_s1 = smul.f32 0.00390625, %s453_s13 }
 0x262   :  { %s420_s16 = sadd.f32 %s419_s1, %s354_s12 }
 0x264   :  { %v421_v44 = vstv %s420_s16 }
 0x265   :  { %422 = vst [vmem:[#allocation11] sm:$0x1] %v421_v44 }
 0x266   :  { %579 = shalt.err (!%p576_p8)
}
 0x267   :  { %s580_s21 = scalar_lea.hbm %s733_s4, 16 }
 0x268   :  { %p581_p9 = scmp.ne.s32.totalorder %s733_s4, %s580_s21  ;;  %p584_p10 = scmp.lt.u32.totalorder %s580_s21, %s733_s4 }
 0x26a   :  { %p586_p11 = pnand %p584_p10, %p581_p9 }
 0x26c   :  { %589 = shalt.err (!%p586_p11)
}
 0x26d   :  { %438 = dma.vmem_to_hbm [thread:$0]  %s436_s15, 16, %s733_s4, [#allocation5]  }
 0x26e   :  { %596 = dma.done.wait [#allocation5], 16  }
 0x26f   :  { %597 = vsyncadd [#allocation5], 4294967280 }
 0x270   :  { %442 = vsyncpa [#allocation4], 1 }
 0x271   :  { %443 = vsyncpa [#allocation7], 1 }
 0x272   :  { %444 = vsyncpa [#allocation10], 1 }
 0x273   :  { %445 = vsyncpa [#allocation5], 1 }

</bundles_post_ra>
